<compile_context>
chip_gen: v6e
topology: v6e:2x2x1
jax: 0.10.0
libtpu: 0.0.40
codegen_flags: <defaults>
</compile_context>

<pallas_src>
import functools
from string import ascii_lowercase as letters

import numpy as np
import jax
import jax.numpy as jnp
from jax import lax
from jax.experimental import pallas as pl
from jax.experimental.pallas import tpu as pltpu


# ----------------------------------------------------------------------------
# Parameter construction (mirrors TTConvEinsum.__init__ / _hrinchuk_init)
# ----------------------------------------------------------------------------
def init_tt_conv_params(key, in_c_modes, out_c_modes, kernel_size, ranks):
    d = len(in_c_modes)
    if not isinstance(ranks, (list, tuple)):
        ranks = [ranks] * d
    max_ranks = []
    cnt1 = float(kernel_size ** 2)
    cnt2 = float(np.prod(in_c_modes) * np.prod(out_c_modes))
    for i in range(d):
        max_ranks.append(int(min(cnt1, cnt2)))
        factor = in_c_modes[i] * out_c_modes[i]
        cnt1 *= factor
        cnt2 /= factor
    resolved = []
    for i in range(d):
        r = ranks[i]
        if r is None:
            resolved.append(max_ranks[i])
        elif isinstance(r, int):
            resolved.append(r)
        else:  # float fraction of max rank
            resolved.append(int(r * max_ranks[i]))
    resolved.append(1)

    # _hrinchuk_init std (self.ranks at call time includes the trailing 1)
    fan_in = float(np.prod(in_c_modes)) * kernel_size ** 2
    old_var = 2.0 / fan_in
    new_std_base = old_var / float(np.prod(resolved))
    new_std_power = 0.5 / (len(resolved) + 1)
    std = float(np.power(new_std_base, new_std_power))

    keys = jax.random.split(key, d + 1)
    core0 = std * jax.random.normal(
        keys[0], (resolved[0], 1, kernel_size, kernel_size), jnp.float32)
    cores = [
        std * jax.random.normal(
            keys[i + 1],
            (in_c_modes[i], out_c_modes[i], resolved[i], resolved[i + 1]),
            jnp.float32)
        for i in range(d)
    ]
    return core0, cores, resolved


def build_tt_matrix(cores, in_modes, out_modes, ranks):
    """Fold TT cores into M[(i_0..i_{d-1}, s0), (j_0..j_{d-1})] (tiny, param-only glue)."""
    d = len(in_modes)
    M = jnp.eye(ranks[0], dtype=jnp.float32)  # axes: (s0, s_current)
    for k in range(d):
        # M axes: (i_0..i_{k-1}, s0, j_0..j_{k-1}, s_k)
        M = jnp.tensordot(M, cores[k], axes=[[M.ndim - 1], [2]])
        nd = M.ndim
        # now: (i_0..i_{k-1}, s0, j_0..j_{k-1}, i_k, j_k, s_{k+1})
        perm = list(range(k)) + [nd - 3, k] + list(range(k + 1, 2 * k + 1)) + [nd - 2, nd - 1]
        M = jnp.transpose(M, perm)
        # now: (i_0..i_k, s0, j_0..j_k, s_{k+1})
    return M.reshape(int(np.prod(in_modes)) * ranks[0], int(np.prod(out_modes)))


def build_dense_filter(core0, tt_matrix, in_c, out_c, r0, k):
    """Fold core0 into the TT matrix -> dense filter W[C_out, C_in*k*k] (param-only glue).

    W[co, ci, kh, kw] = sum_r M[ci*r0 + r, co] * core0[r, 0, kh, kw]
    """
    m3 = tt_matrix.reshape(in_c, r0, out_c)
    w = jnp.einsum('cro,rhw->ochw', m3, core0[:, 0])
    return w.reshape(out_c, in_c * k * k).astype(jnp.float32)


# ----------------------------------------------------------------------------
# Fused Pallas kernel: in-VMEM im2col + one MXU matmul per image
# ----------------------------------------------------------------------------
def _ttconv_fused_kernel(w_ref, x_ref, o_ref, a_ref, *, taps, lcols, bblk):
    """Fused TT-conv for a block of `bblk` images.

    w_ref : VMEM (C_out, K)        folded dense filter, K = C_in*k*k
    x_ref : VMEM (bblk, CC, Lq)    phase-split, spatially flattened, padded input
    o_ref : VMEM (bblk, C_out, Lcols)  Lcols = Ho*Wq pixel columns (lane-dense)
    a_ref : VMEM scratch (K, Lcols)    im2col matrix, reused per image
    taps  : static tuple of (phase_channel, flat_offset) per filter tap
    """
    w = w_ref[...]                                  # hoisted; reused for all images
    for b in range(bblk):
        # Build im2col in VMEM from contiguous shifted slices (no HBM round-trip).
        for t, (cc, off) in enumerate(taps):
            a_ref[t:t + 1, :] = x_ref[b, cc:cc + 1, off:off + lcols]
        # Single MXU matmul mixes channels+taps for every pixel at once.
        o_ref[b] = jnp.dot(w, a_ref[...], preferred_element_type=jnp.float32)


def _pick_batch_block(B, max_block=8):
    """Batch tile: fatten per-step matmuls while keeping >= 2 grid steps when possible
    (feeds v7x's two TensorCores / fills the software pipeline)."""
    if B <= 2:
        return 1
    for cand in range(min(max_block, B // 2), 0, -1):
        if B % cand == 0:
            return cand
    return 1


def tt_conv_forward_pallas(x, w_full, *, k, stride, padding):
    """x: (B, C_in, H, W) f32, w_full: (C_out, C_in*k*k) folded dense filter."""
    B, C_in, H, W = x.shape
    C_out = w_full.shape[0]
    s = int(stride)
    Hp, Wp = H + 2 * padding, W + 2 * padding
    Ho = (Hp - k) // s + 1
    Wo = (Wp - k) // s + 1

    # --- host glue: pad + phase (space-to-depth) split + flatten (identity for s=1) ---
    Hp2 = -(-Hp // s) * s
    Wp2 = -(-Wp // s) * s
    xpad = jnp.pad(x.astype(jnp.float32),
                   ((0, 0), (0, 0),
                    (padding, padding + (Hp2 - Hp)),
                    (padding, padding + (Wp2 - Wp))))
    Hq, Wq = Hp2 // s, Wp2 // s
    # xph[b, ci, ph, pw, u, v] = xpad[b, ci, u*s + ph, v*s + pw]
    xph = xpad.reshape(B, C_in, Hq, s, Wq, s).transpose(0, 1, 3, 5, 2, 4)
    CC = C_in * s * s
    Lcols = Ho * Wq                      # pixel columns per image (Wq-Wo garbage cols/row)
    extra = k                            # right-pad so every tap slice stays in-bounds
    xflat = jnp.pad(xph.reshape(B, CC, Hq * Wq), ((0, 0), (0, 0), (0, extra)))
    Lq = Hq * Wq + extra

    # Static tap table: t = ci*k*k + dh*k + dw  ->  (phase channel, flat offset)
    taps = []
    for ci in range(C_in):
        for dh in range(k):
            for dw in range(k):
                ph, qh = dh % s, dh // s
                pw, qw = dw % s, dw // s
                taps.append(((ci * s + ph) * s + pw, qh * Wq + qw))
    taps = tuple(taps)
    K = C_in * k * k

    bblk = _pick_batch_block(B)
    grid = (B // bblk,)

    out = pl.pallas_call(
        functools.partial(_ttconv_fused_kernel, taps=taps, lcols=Lcols, bblk=bblk),
        grid=grid,
        in_specs=[
            pl.BlockSpec((C_out, K), lambda i: (0, 0)),          # folded filter (constant)
            pl.BlockSpec((bblk, CC, Lq), lambda i: (i, 0, 0)),    # batch tile of inputs
        ],
        out_specs=pl.BlockSpec((bblk, C_out, Lcols), lambda i: (i, 0, 0)),
        out_shape=jax.ShapeDtypeStruct((B, C_out, Lcols), jnp.float32),
        scratch_shapes=[pltpu.VMEM((K, Lcols), jnp.float32)],
        compiler_params=pltpu.CompilerParams(dimension_semantics=("parallel",)),
    )(w_full, xflat)

    # Drop the (Wq - Wo) wrap-around garbage columns per output row.
    return out.reshape(B, C_out, Ho, Wq)[:, :, :, :Wo]


# ----------------------------------------------------------------------------
# Pure-JAX reference replicating the torch forward (conv2d + einsum chain)
# ----------------------------------------------------------------------------
def tt_conv_reference(x, core0, cores, in_modes, out_modes, ranks, stride, padding):
    d = len(in_modes)
    B, C, H, W = x.shape
    tmp = x.reshape(B * C, 1, H, W)
    tmp = lax.conv_general_dilated(
        tmp, core0, (stride, stride),
        [(padding, padding), (padding, padding)],
        dimension_numbers=("NCHW", "OIHW", "NCHW"))
    h, w = tmp.shape[-2:]
    tmp = tmp.reshape((B, *in_modes, ranks[0], h, w))
    for i in range(d):
        einstr = ("B" + letters[:i] + "I" + letters[i:d - 1] + "SHW,IJST->"
                  + "B" + letters[:i] + "J" + letters[i:d - 1] + "THW")
        tmp = jnp.einsum(einstr, tmp, cores[i])
    out_c = int(np.prod(out_modes))
    return tmp.reshape(B, out_c, h, w)


if __name__ == "__main__":
    # Small, module-consistent configuration.
    in_c_modes = [2, 2]      # C_in  = 4
    out_c_modes = [2, 2]     # C_out = 4
    kernel_size = 3
    requested_ranks = [3, 2]
    stride = 1
    padding = 1
    B, H, W = 2, 16, 16

    key = jax.random.PRNGKey(0)
    k_x, k_p = jax.random.split(key)
    core0, cores, ranks = init_tt_conv_params(
        k_p, in_c_modes, out_c_modes, kernel_size, requested_ranks)

    C_in = int(np.prod(in_c_modes))
    C_out = int(np.prod(out_c_modes))
    x = jax.random.normal(k_x, (B, C_in, H, W), jnp.float32)

    # Parameter-only folding (host-side glue, no activation work).
    tt_matrix = build_tt_matrix(cores, in_c_modes, out_c_modes, ranks)
    w_full = build_dense_filter(core0, tt_matrix, C_in, C_out, ranks[0], kernel_size)

    out = tt_conv_forward_pallas(x, w_full, k=kernel_size, stride=stride, padding=padding)
    out = jax.block_until_ready(out)

    ref = tt_conv_reference(x, core0, cores, in_c_modes, out_c_modes,
                            ranks, stride, padding)
    assert out.shape == ref.shape, (out.shape, ref.shape)
    np.testing.assert_allclose(np.asarray(out), np.asarray(ref), rtol=1e-4, atol=1e-4)
    print("KERNEL_OK")
</pallas_src>

<mosaic_0001>
module attributes {stable_mosaic.version = 11 : i64} {
  func.func @_ttconv_fused_kernel(%arg0: i32, %arg1: memref<4x36xf32, #tpu.memory_space<vmem>>, %arg2: memref<1x4x327xf32, #tpu.memory_space<vmem>>, %arg3: memref<1x4x288xf32, #tpu.memory_space<vmem>>, %arg4: memref<36x288xf32, #tpu.memory_space<vmem>>) attributes {dimension_semantics = [#tpu.dimension_semantics<parallel>], iteration_bounds = array<i64: 2>, scalar_prefetch = 0 : i64, scratch_operands = 1 : i64, tpu.core_type = #tpu.core_type<tc>, window_params = [{pipeline_mode = #tpu.pipeline_mode<synchronous>, transform_indices = @transform_0, window_bounds = array<i64: 4, 36>}, {transform_indices = @transform_1, window_bounds = array<i64: 1, 4, 327>}, {transform_indices = @transform_2, window_bounds = array<i64: 1, 4, 288>}]} {
    %c0 = arith.constant 0 : index
    %c0_0 = arith.constant 0 : index
    %0 = vector.load %arg1[%c0, %c0_0] : memref<4x36xf32, #tpu.memory_space<vmem>>, vector<4x36xf32>
    %c0_1 = arith.constant 0 : index
    %c0_2 = arith.constant 0 : index
    %c0_3 = arith.constant 0 : index
    %1 = vector.load %arg2[%c0_1, %c0_2, %c0_3] : memref<1x4x327xf32, #tpu.memory_space<vmem>>, vector<1x1x288xf32>
    %2 = vector.shape_cast %1 : vector<1x1x288xf32> to vector<1x288xf32>
    %c0_4 = arith.constant 0 : index
    %c0_5 = arith.constant 0 : index
    %3 = vector.load %arg4[%c0_4, %c0_5] : memref<36x288xf32, #tpu.memory_space<vmem>>, vector<1x288xf32>
    tpu.vector_store %arg4[%c0_4, %c0_5], %2 {strides = array<i32>} : memref<36x288xf32, #tpu.memory_space<vmem>>, vector<1x288xf32>,
    %c0_6 = arith.constant 0 : index
    %c0_7 = arith.constant 0 : index
    %c1 = arith.constant 1 : index
    %4 = vector.load %arg2[%c0_6, %c0_7, %c1] : memref<1x4x327xf32, #tpu.memory_space<vmem>>, vector<1x1x288xf32>
    %5 = vector.shape_cast %4 : vector<1x1x288xf32> to vector<1x288xf32>
    %c1_8 = arith.constant 1 : index
    %c0_9 = arith.constant 0 : index
    %6 = vector.load %arg4[%c1_8, %c0_9] : memref<36x288xf32, #tpu.memory_space<vmem>>, vector<1x288xf32>
    tpu.vector_store %arg4[%c1_8, %c0_9], %5 {strides = array<i32>} : memref<36x288xf32, #tpu.memory_space<vmem>>, vector<1x288xf32>,
    %c0_10 = arith.constant 0 : index
    %c0_11 = arith.constant 0 : index
    %c2 = arith.constant 2 : index
    %7 = vector.load %arg2[%c0_10, %c0_11, %c2] : memref<1x4x327xf32, #tpu.memory_space<vmem>>, vector<1x1x288xf32>
    %8 = vector.shape_cast %7 : vector<1x1x288xf32> to vector<1x288xf32>
    %c2_12 = arith.constant 2 : index
    %c0_13 = arith.constant 0 : index
    %9 = vector.load %arg4[%c2_12, %c0_13] : memref<36x288xf32, #tpu.memory_space<vmem>>, vector<1x288xf32>
    tpu.vector_store %arg4[%c2_12, %c0_13], %8 {strides = array<i32>} : memref<36x288xf32, #tpu.memory_space<vmem>>, vector<1x288xf32>,
    %c0_14 = arith.constant 0 : index
    %c0_15 = arith.constant 0 : index
    %c18 = arith.constant 18 : index
    %10 = vector.load %arg2[%c0_14, %c0_15, %c18] : memref<1x4x327xf32, #tpu.memory_space<vmem>>, vector<1x1x288xf32>
    %11 = vector.shape_cast %10 : vector<1x1x288xf32> to vector<1x288xf32>
    %c3 = arith.constant 3 : index
    %c0_16 = arith.constant 0 : index
    %12 = vector.load %arg4[%c3, %c0_16] : memref<36x288xf32, #tpu.memory_space<vmem>>, vector<1x288xf32>
    tpu.vector_store %arg4[%c3, %c0_16], %11 {strides = array<i32>} : memref<36x288xf32, #tpu.memory_space<vmem>>, vector<1x288xf32>,
    %c0_17 = arith.constant 0 : index
    %c0_18 = arith.constant 0 : index
    %c19 = arith.constant 19 : index
    %13 = vector.load %arg2[%c0_17, %c0_18, %c19] : memref<1x4x327xf32, #tpu.memory_space<vmem>>, vector<1x1x288xf32>
    %14 = vector.shape_cast %13 : vector<1x1x288xf32> to vector<1x288xf32>
    %c4 = arith.constant 4 : index
    %c0_19 = arith.constant 0 : index
    %15 = vector.load %arg4[%c4, %c0_19] : memref<36x288xf32, #tpu.memory_space<vmem>>, vector<1x288xf32>
    tpu.vector_store %arg4[%c4, %c0_19], %14 {strides = array<i32>} : memref<36x288xf32, #tpu.memory_space<vmem>>, vector<1x288xf32>,
    %c0_20 = arith.constant 0 : index
    %c0_21 = arith.constant 0 : index
    %c20 = arith.constant 20 : index
    %16 = vector.load %arg2[%c0_20, %c0_21, %c20] : memref<1x4x327xf32, #tpu.memory_space<vmem>>, vector<1x1x288xf32>
    %17 = vector.shape_cast %16 : vector<1x1x288xf32> to vector<1x288xf32>
    %c5 = arith.constant 5 : index
    %c0_22 = arith.constant 0 : index
    %18 = vector.load %arg4[%c5, %c0_22] : memref<36x288xf32, #tpu.memory_space<vmem>>, vector<1x288xf32>
    tpu.vector_store %arg4[%c5, %c0_22], %17 {strides = array<i32>} : memref<36x288xf32, #tpu.memory_space<vmem>>, vector<1x288xf32>,
    %c0_23 = arith.constant 0 : index
    %c0_24 = arith.constant 0 : index
    %c36 = arith.constant 36 : index
    %19 = vector.load %arg2[%c0_23, %c0_24, %c36] : memref<1x4x327xf32, #tpu.memory_space<vmem>>, vector<1x1x288xf32>
    %20 = vector.shape_cast %19 : vector<1x1x288xf32> to vector<1x288xf32>
    %c6 = arith.constant 6 : index
    %c0_25 = arith.constant 0 : index
    %21 = vector.load %arg4[%c6, %c0_25] : memref<36x288xf32, #tpu.memory_space<vmem>>, vector<1x288xf32>
    tpu.vector_store %arg4[%c6, %c0_25], %20 {strides = array<i32>} : memref<36x288xf32, #tpu.memory_space<vmem>>, vector<1x288xf32>,
    %c0_26 = arith.constant 0 : index
    %c0_27 = arith.constant 0 : index
    %c37 = arith.constant 37 : index
    %22 = vector.load %arg2[%c0_26, %c0_27, %c37] : memref<1x4x327xf32, #tpu.memory_space<vmem>>, vector<1x1x288xf32>
    %23 = vector.shape_cast %22 : vector<1x1x288xf32> to vector<1x288xf32>
    %c7 = arith.constant 7 : index
    %c0_28 = arith.constant 0 : index
    %24 = vector.load %arg4[%c7, %c0_28] : memref<36x288xf32, #tpu.memory_space<vmem>>, vector<1x288xf32>
    tpu.vector_store %arg4[%c7, %c0_28], %23 {strides = array<i32>} : memref<36x288xf32, #tpu.memory_space<vmem>>, vector<1x288xf32>,
    %c0_29 = arith.constant 0 : index
    %c0_30 = arith.constant 0 : index
    %c38 = arith.constant 38 : index
    %25 = vector.load %arg2[%c0_29, %c0_30, %c38] : memref<1x4x327xf32, #tpu.memory_space<vmem>>, vector<1x1x288xf32>
    %26 = vector.shape_cast %25 : vector<1x1x288xf32> to vector<1x288xf32>
    %c8 = arith.constant 8 : index
    %c0_31 = arith.constant 0 : index
    %27 = vector.load %arg4[%c8, %c0_31] : memref<36x288xf32, #tpu.memory_space<vmem>>, vector<1x288xf32>
    tpu.vector_store %arg4[%c8, %c0_31], %26 {strides = array<i32>} : memref<36x288xf32, #tpu.memory_space<vmem>>, vector<1x288xf32>,
    %c0_32 = arith.constant 0 : index
    %c1_33 = arith.constant 1 : index
    %c0_34 = arith.constant 0 : index
    %28 = vector.load %arg2[%c0_32, %c1_33, %c0_34] : memref<1x4x327xf32, #tpu.memory_space<vmem>>, vector<1x1x288xf32>
    %29 = vector.shape_cast %28 : vector<1x1x288xf32> to vector<1x288xf32>
    %c9 = arith.constant 9 : index
    %c0_35 = arith.constant 0 : index
    %30 = vector.load %arg4[%c9, %c0_35] : memref<36x288xf32, #tpu.memory_space<vmem>>, vector<1x288xf32>
    tpu.vector_store %arg4[%c9, %c0_35], %29 {strides = array<i32>} : memref<36x288xf32, #tpu.memory_space<vmem>>, vector<1x288xf32>,
    %c0_36 = arith.constant 0 : index
    %c1_37 = arith.constant 1 : index
    %c1_38 = arith.constant 1 : index
    %31 = vector.load %arg2[%c0_36, %c1_37, %c1_38] : memref<1x4x327xf32, #tpu.memory_space<vmem>>, vector<1x1x288xf32>
    %32 = vector.shape_cast %31 : vector<1x1x288xf32> to vector<1x288xf32>
    %c10 = arith.constant 10 : index
    %c0_39 = arith.constant 0 : index
    %33 = vector.load %arg4[%c10, %c0_39] : memref<36x288xf32, #tpu.memory_space<vmem>>, vector<1x288xf32>
    tpu.vector_store %arg4[%c10, %c0_39], %32 {strides = array<i32>} : memref<36x288xf32, #tpu.memory_space<vmem>>, vector<1x288xf32>,
    %c0_40 = arith.constant 0 : index
    %c1_41 = arith.constant 1 : index
    %c2_42 = arith.constant 2 : index
    %34 = vector.load %arg2[%c0_40, %c1_41, %c2_42] : memref<1x4x327xf32, #tpu.memory_space<vmem>>, vector<1x1x288xf32>
    %35 = vector.shape_cast %34 : vector<1x1x288xf32> to vector<1x288xf32>
    %c11 = arith.constant 11 : index
    %c0_43 = arith.constant 0 : index
    %36 = vector.load %arg4[%c11, %c0_43] : memref<36x288xf32, #tpu.memory_space<vmem>>, vector<1x288xf32>
    tpu.vector_store %arg4[%c11, %c0_43], %35 {strides = array<i32>} : memref<36x288xf32, #tpu.memory_space<vmem>>, vector<1x288xf32>,
    %c0_44 = arith.constant 0 : index
    %c1_45 = arith.constant 1 : index
    %c18_46 = arith.constant 18 : index
    %37 = vector.load %arg2[%c0_44, %c1_45, %c18_46] : memref<1x4x327xf32, #tpu.memory_space<vmem>>, vector<1x1x288xf32>
    %38 = vector.shape_cast %37 : vector<1x1x288xf32> to vector<1x288xf32>
    %c12 = arith.constant 12 : index
    %c0_47 = arith.constant 0 : index
    %39 = vector.load %arg4[%c12, %c0_47] : memref<36x288xf32, #tpu.memory_space<vmem>>, vector<1x288xf32>
    tpu.vector_store %arg4[%c12, %c0_47], %38 {strides = array<i32>} : memref<36x288xf32, #tpu.memory_space<vmem>>, vector<1x288xf32>,
    %c0_48 = arith.constant 0 : index
    %c1_49 = arith.constant 1 : index
    %c19_50 = arith.constant 19 : index
    %40 = vector.load %arg2[%c0_48, %c1_49, %c19_50] : memref<1x4x327xf32, #tpu.memory_space<vmem>>, vector<1x1x288xf32>
    %41 = vector.shape_cast %40 : vector<1x1x288xf32> to vector<1x288xf32>
    %c13 = arith.constant 13 : index
    %c0_51 = arith.constant 0 : index
    %42 = vector.load %arg4[%c13, %c0_51] : memref<36x288xf32, #tpu.memory_space<vmem>>, vector<1x288xf32>
    tpu.vector_store %arg4[%c13, %c0_51], %41 {strides = array<i32>} : memref<36x288xf32, #tpu.memory_space<vmem>>, vector<1x288xf32>,
    %c0_52 = arith.constant 0 : index
    %c1_53 = arith.constant 1 : index
    %c20_54 = arith.constant 20 : index
    %43 = vector.load %arg2[%c0_52, %c1_53, %c20_54] : memref<1x4x327xf32, #tpu.memory_space<vmem>>, vector<1x1x288xf32>
    %44 = vector.shape_cast %43 : vector<1x1x288xf32> to vector<1x288xf32>
    %c14 = arith.constant 14 : index
    %c0_55 = arith.constant 0 : index
    %45 = vector.load %arg4[%c14, %c0_55] : memref<36x288xf32, #tpu.memory_space<vmem>>, vector<1x288xf32>
    tpu.vector_store %arg4[%c14, %c0_55], %44 {strides = array<i32>} : memref<36x288xf32, #tpu.memory_space<vmem>>, vector<1x288xf32>,
    %c0_56 = arith.constant 0 : index
    %c1_57 = arith.constant 1 : index
    %c36_58 = arith.constant 36 : index
    %46 = vector.load %arg2[%c0_56, %c1_57, %c36_58] : memref<1x4x327xf32, #tpu.memory_space<vmem>>, vector<1x1x288xf32>
    %47 = vector.shape_cast %46 : vector<1x1x288xf32> to vector<1x288xf32>
    %c15 = arith.constant 15 : index
    %c0_59 = arith.constant 0 : index
    %48 = vector.load %arg4[%c15, %c0_59] : memref<36x288xf32, #tpu.memory_space<vmem>>, vector<1x288xf32>
    tpu.vector_store %arg4[%c15, %c0_59], %47 {strides = array<i32>} : memref<36x288xf32, #tpu.memory_space<vmem>>, vector<1x288xf32>,
    %c0_60 = arith.constant 0 : index
    %c1_61 = arith.constant 1 : index
    %c37_62 = arith.constant 37 : index
    %49 = vector.load %arg2[%c0_60, %c1_61, %c37_62] : memref<1x4x327xf32, #tpu.memory_space<vmem>>, vector<1x1x288xf32>
    %50 = vector.shape_cast %49 : vector<1x1x288xf32> to vector<1x288xf32>
    %c16 = arith.constant 16 : index
    %c0_63 = arith.constant 0 : index
    %51 = vector.load %arg4[%c16, %c0_63] : memref<36x288xf32, #tpu.memory_space<vmem>>, vector<1x288xf32>
    tpu.vector_store %arg4[%c16, %c0_63], %50 {strides = array<i32>} : memref<36x288xf32, #tpu.memory_space<vmem>>, vector<1x288xf32>,
    %c0_64 = arith.constant 0 : index
    %c1_65 = arith.constant 1 : index
    %c38_66 = arith.constant 38 : index
    %52 = vector.load %arg2[%c0_64, %c1_65, %c38_66] : memref<1x4x327xf32, #tpu.memory_space<vmem>>, vector<1x1x288xf32>
    %53 = vector.shape_cast %52 : vector<1x1x288xf32> to vector<1x288xf32>
    %c17 = arith.constant 17 : index
    %c0_67 = arith.constant 0 : index
    %54 = vector.load %arg4[%c17, %c0_67] : memref<36x288xf32, #tpu.memory_space<vmem>>, vector<1x288xf32>
    tpu.vector_store %arg4[%c17, %c0_67], %53 {strides = array<i32>} : memref<36x288xf32, #tpu.memory_space<vmem>>, vector<1x288xf32>,
    %c0_68 = arith.constant 0 : index
    %c2_69 = arith.constant 2 : index
    %c0_70 = arith.constant 0 : index
    %55 = vector.load %arg2[%c0_68, %c2_69, %c0_70] : memref<1x4x327xf32, #tpu.memory_space<vmem>>, vector<1x1x288xf32>
    %56 = vector.shape_cast %55 : vector<1x1x288xf32> to vector<1x288xf32>
    %c18_71 = arith.constant 18 : index
    %c0_72 = arith.constant 0 : index
    %57 = vector.load %arg4[%c18_71, %c0_72] : memref<36x288xf32, #tpu.memory_space<vmem>>, vector<1x288xf32>
    tpu.vector_store %arg4[%c18_71, %c0_72], %56 {strides = array<i32>} : memref<36x288xf32, #tpu.memory_space<vmem>>, vector<1x288xf32>,
    %c0_73 = arith.constant 0 : index
    %c2_74 = arith.constant 2 : index
    %c1_75 = arith.constant 1 : index
    %58 = vector.load %arg2[%c0_73, %c2_74, %c1_75] : memref<1x4x327xf32, #tpu.memory_space<vmem>>, vector<1x1x288xf32>
    %59 = vector.shape_cast %58 : vector<1x1x288xf32> to vector<1x288xf32>
    %c19_76 = arith.constant 19 : index
    %c0_77 = arith.constant 0 : index
    %60 = vector.load %arg4[%c19_76, %c0_77] : memref<36x288xf32, #tpu.memory_space<vmem>>, vector<1x288xf32>
    tpu.vector_store %arg4[%c19_76, %c0_77], %59 {strides = array<i32>} : memref<36x288xf32, #tpu.memory_space<vmem>>, vector<1x288xf32>,
    %c0_78 = arith.constant 0 : index
    %c2_79 = arith.constant 2 : index
    %c2_80 = arith.constant 2 : index
    %61 = vector.load %arg2[%c0_78, %c2_79, %c2_80] : memref<1x4x327xf32, #tpu.memory_space<vmem>>, vector<1x1x288xf32>
    %62 = vector.shape_cast %61 : vector<1x1x288xf32> to vector<1x288xf32>
    %c20_81 = arith.constant 20 : index
    %c0_82 = arith.constant 0 : index
    %63 = vector.load %arg4[%c20_81, %c0_82] : memref<36x288xf32, #tpu.memory_space<vmem>>, vector<1x288xf32>
    tpu.vector_store %arg4[%c20_81, %c0_82], %62 {strides = array<i32>} : memref<36x288xf32, #tpu.memory_space<vmem>>, vector<1x288xf32>,
    %c0_83 = arith.constant 0 : index
    %c2_84 = arith.constant 2 : index
    %c18_85 = arith.constant 18 : index
    %64 = vector.load %arg2[%c0_83, %c2_84, %c18_85] : memref<1x4x327xf32, #tpu.memory_space<vmem>>, vector<1x1x288xf32>
    %65 = vector.shape_cast %64 : vector<1x1x288xf32> to vector<1x288xf32>
    %c21 = arith.constant 21 : index
    %c0_86 = arith.constant 0 : index
    %66 = vector.load %arg4[%c21, %c0_86] : memref<36x288xf32, #tpu.memory_space<vmem>>, vector<1x288xf32>
    tpu.vector_store %arg4[%c21, %c0_86], %65 {strides = array<i32>} : memref<36x288xf32, #tpu.memory_space<vmem>>, vector<1x288xf32>,
    %c0_87 = arith.constant 0 : index
    %c2_88 = arith.constant 2 : index
    %c19_89 = arith.constant 19 : index
    %67 = vector.load %arg2[%c0_87, %c2_88, %c19_89] : memref<1x4x327xf32, #tpu.memory_space<vmem>>, vector<1x1x288xf32>
    %68 = vector.shape_cast %67 : vector<1x1x288xf32> to vector<1x288xf32>
    %c22 = arith.constant 22 : index
    %c0_90 = arith.constant 0 : index
    %69 = vector.load %arg4[%c22, %c0_90] : memref<36x288xf32, #tpu.memory_space<vmem>>, vector<1x288xf32>
    tpu.vector_store %arg4[%c22, %c0_90], %68 {strides = array<i32>} : memref<36x288xf32, #tpu.memory_space<vmem>>, vector<1x288xf32>,
    %c0_91 = arith.constant 0 : index
    %c2_92 = arith.constant 2 : index
    %c20_93 = arith.constant 20 : index
    %70 = vector.load %arg2[%c0_91, %c2_92, %c20_93] : memref<1x4x327xf32, #tpu.memory_space<vmem>>, vector<1x1x288xf32>
    %71 = vector.shape_cast %70 : vector<1x1x288xf32> to vector<1x288xf32>
    %c23 = arith.constant 23 : index
    %c0_94 = arith.constant 0 : index
    %72 = vector.load %arg4[%c23, %c0_94] : memref<36x288xf32, #tpu.memory_space<vmem>>, vector<1x288xf32>
    tpu.vector_store %arg4[%c23, %c0_94], %71 {strides = array<i32>} : memref<36x288xf32, #tpu.memory_space<vmem>>, vector<1x288xf32>,
    %c0_95 = arith.constant 0 : index
    %c2_96 = arith.constant 2 : index
    %c36_97 = arith.constant 36 : index
    %73 = vector.load %arg2[%c0_95, %c2_96, %c36_97] : memref<1x4x327xf32, #tpu.memory_space<vmem>>, vector<1x1x288xf32>
    %74 = vector.shape_cast %73 : vector<1x1x288xf32> to vector<1x288xf32>
    %c24 = arith.constant 24 : index
    %c0_98 = arith.constant 0 : index
    %75 = vector.load %arg4[%c24, %c0_98] : memref<36x288xf32, #tpu.memory_space<vmem>>, vector<1x288xf32>
    tpu.vector_store %arg4[%c24, %c0_98], %74 {strides = array<i32>} : memref<36x288xf32, #tpu.memory_space<vmem>>, vector<1x288xf32>,
    %c0_99 = arith.constant 0 : index
    %c2_100 = arith.constant 2 : index
    %c37_101 = arith.constant 37 : index
    %76 = vector.load %arg2[%c0_99, %c2_100, %c37_101] : memref<1x4x327xf32, #tpu.memory_space<vmem>>, vector<1x1x288xf32>
    %77 = vector.shape_cast %76 : vector<1x1x288xf32> to vector<1x288xf32>
    %c25 = arith.constant 25 : index
    %c0_102 = arith.constant 0 : index
    %78 = vector.load %arg4[%c25, %c0_102] : memref<36x288xf32, #tpu.memory_space<vmem>>, vector<1x288xf32>
    tpu.vector_store %arg4[%c25, %c0_102], %77 {strides = array<i32>} : memref<36x288xf32, #tpu.memory_space<vmem>>, vector<1x288xf32>,
    %c0_103 = arith.constant 0 : index
    %c2_104 = arith.constant 2 : index
    %c38_105 = arith.constant 38 : index
    %79 = vector.load %arg2[%c0_103, %c2_104, %c38_105] : memref<1x4x327xf32, #tpu.memory_space<vmem>>, vector<1x1x288xf32>
    %80 = vector.shape_cast %79 : vector<1x1x288xf32> to vector<1x288xf32>
    %c26 = arith.constant 26 : index
    %c0_106 = arith.constant 0 : index
    %81 = vector.load %arg4[%c26, %c0_106] : memref<36x288xf32, #tpu.memory_space<vmem>>, vector<1x288xf32>
    tpu.vector_store %arg4[%c26, %c0_106], %80 {strides = array<i32>} : memref<36x288xf32, #tpu.memory_space<vmem>>, vector<1x288xf32>,
    %c0_107 = arith.constant 0 : index
    %c3_108 = arith.constant 3 : index
    %c0_109 = arith.constant 0 : index
    %82 = vector.load %arg2[%c0_107, %c3_108, %c0_109] : memref<1x4x327xf32, #tpu.memory_space<vmem>>, vector<1x1x288xf32>
    %83 = vector.shape_cast %82 : vector<1x1x288xf32> to vector<1x288xf32>
    %c27 = arith.constant 27 : index
    %c0_110 = arith.constant 0 : index
    %84 = vector.load %arg4[%c27, %c0_110] : memref<36x288xf32, #tpu.memory_space<vmem>>, vector<1x288xf32>
    tpu.vector_store %arg4[%c27, %c0_110], %83 {strides = array<i32>} : memref<36x288xf32, #tpu.memory_space<vmem>>, vector<1x288xf32>,
    %c0_111 = arith.constant 0 : index
    %c3_112 = arith.constant 3 : index
    %c1_113 = arith.constant 1 : index
    %85 = vector.load %arg2[%c0_111, %c3_112, %c1_113] : memref<1x4x327xf32, #tpu.memory_space<vmem>>, vector<1x1x288xf32>
    %86 = vector.shape_cast %85 : vector<1x1x288xf32> to vector<1x288xf32>
    %c28 = arith.constant 28 : index
    %c0_114 = arith.constant 0 : index
    %87 = vector.load %arg4[%c28, %c0_114] : memref<36x288xf32, #tpu.memory_space<vmem>>, vector<1x288xf32>
    tpu.vector_store %arg4[%c28, %c0_114], %86 {strides = array<i32>} : memref<36x288xf32, #tpu.memory_space<vmem>>, vector<1x288xf32>,
    %c0_115 = arith.constant 0 : index
    %c3_116 = arith.constant 3 : index
    %c2_117 = arith.constant 2 : index
    %88 = vector.load %arg2[%c0_115, %c3_116, %c2_117] : memref<1x4x327xf32, #tpu.memory_space<vmem>>, vector<1x1x288xf32>
    %89 = vector.shape_cast %88 : vector<1x1x288xf32> to vector<1x288xf32>
    %c29 = arith.constant 29 : index
    %c0_118 = arith.constant 0 : index
    %90 = vector.load %arg4[%c29, %c0_118] : memref<36x288xf32, #tpu.memory_space<vmem>>, vector<1x288xf32>
    tpu.vector_store %arg4[%c29, %c0_118], %89 {strides = array<i32>} : memref<36x288xf32, #tpu.memory_space<vmem>>, vector<1x288xf32>,
    %c0_119 = arith.constant 0 : index
    %c3_120 = arith.constant 3 : index
    %c18_121 = arith.constant 18 : index
    %91 = vector.load %arg2[%c0_119, %c3_120, %c18_121] : memref<1x4x327xf32, #tpu.memory_space<vmem>>, vector<1x1x288xf32>
    %92 = vector.shape_cast %91 : vector<1x1x288xf32> to vector<1x288xf32>
    %c30 = arith.constant 30 : index
    %c0_122 = arith.constant 0 : index
    %93 = vector.load %arg4[%c30, %c0_122] : memref<36x288xf32, #tpu.memory_space<vmem>>, vector<1x288xf32>
    tpu.vector_store %arg4[%c30, %c0_122], %92 {strides = array<i32>} : memref<36x288xf32, #tpu.memory_space<vmem>>, vector<1x288xf32>,
    %c0_123 = arith.constant 0 : index
    %c3_124 = arith.constant 3 : index
    %c19_125 = arith.constant 19 : index
    %94 = vector.load %arg2[%c0_123, %c3_124, %c19_125] : memref<1x4x327xf32, #tpu.memory_space<vmem>>, vector<1x1x288xf32>
    %95 = vector.shape_cast %94 : vector<1x1x288xf32> to vector<1x288xf32>
    %c31 = arith.constant 31 : index
    %c0_126 = arith.constant 0 : index
    %96 = vector.load %arg4[%c31, %c0_126] : memref<36x288xf32, #tpu.memory_space<vmem>>, vector<1x288xf32>
    tpu.vector_store %arg4[%c31, %c0_126], %95 {strides = array<i32>} : memref<36x288xf32, #tpu.memory_space<vmem>>, vector<1x288xf32>,
    %c0_127 = arith.constant 0 : index
    %c3_128 = arith.constant 3 : index
    %c20_129 = arith.constant 20 : index
    %97 = vector.load %arg2[%c0_127, %c3_128, %c20_129] : memref<1x4x327xf32, #tpu.memory_space<vmem>>, vector<1x1x288xf32>
    %98 = vector.shape_cast %97 : vector<1x1x288xf32> to vector<1x288xf32>
    %c32 = arith.constant 32 : index
    %c0_130 = arith.constant 0 : index
    %99 = vector.load %arg4[%c32, %c0_130] : memref<36x288xf32, #tpu.memory_space<vmem>>, vector<1x288xf32>
    tpu.vector_store %arg4[%c32, %c0_130], %98 {strides = array<i32>} : memref<36x288xf32, #tpu.memory_space<vmem>>, vector<1x288xf32>,
    %c0_131 = arith.constant 0 : index
    %c3_132 = arith.constant 3 : index
    %c36_133 = arith.constant 36 : index
    %100 = vector.load %arg2[%c0_131, %c3_132, %c36_133] : memref<1x4x327xf32, #tpu.memory_space<vmem>>, vector<1x1x288xf32>
    %101 = vector.shape_cast %100 : vector<1x1x288xf32> to vector<1x288xf32>
    %c33 = arith.constant 33 : index
    %c0_134 = arith.constant 0 : index
    %102 = vector.load %arg4[%c33, %c0_134] : memref<36x288xf32, #tpu.memory_space<vmem>>, vector<1x288xf32>
    tpu.vector_store %arg4[%c33, %c0_134], %101 {strides = array<i32>} : memref<36x288xf32, #tpu.memory_space<vmem>>, vector<1x288xf32>,
    %c0_135 = arith.constant 0 : index
    %c3_136 = arith.constant 3 : index
    %c37_137 = arith.constant 37 : index
    %103 = vector.load %arg2[%c0_135, %c3_136, %c37_137] : memref<1x4x327xf32, #tpu.memory_space<vmem>>, vector<1x1x288xf32>
    %104 = vector.shape_cast %103 : vector<1x1x288xf32> to vector<1x288xf32>
    %c34 = arith.constant 34 : index
    %c0_138 = arith.constant 0 : index
    %105 = vector.load %arg4[%c34, %c0_138] : memref<36x288xf32, #tpu.memory_space<vmem>>, vector<1x288xf32>
    tpu.vector_store %arg4[%c34, %c0_138], %104 {strides = array<i32>} : memref<36x288xf32, #tpu.memory_space<vmem>>, vector<1x288xf32>,
    %c0_139 = arith.constant 0 : index
    %c3_140 = arith.constant 3 : index
    %c38_141 = arith.constant 38 : index
    %106 = vector.load %arg2[%c0_139, %c3_140, %c38_141] : memref<1x4x327xf32, #tpu.memory_space<vmem>>, vector<1x1x288xf32>
    %107 = vector.shape_cast %106 : vector<1x1x288xf32> to vector<1x288xf32>
    %c35 = arith.constant 35 : index
    %c0_142 = arith.constant 0 : index
    %108 = vector.load %arg4[%c35, %c0_142] : memref<36x288xf32, #tpu.memory_space<vmem>>, vector<1x288xf32>
    tpu.vector_store %arg4[%c35, %c0_142], %107 {strides = array<i32>} : memref<36x288xf32, #tpu.memory_space<vmem>>, vector<1x288xf32>,
    %c0_143 = arith.constant 0 : index
    %c0_144 = arith.constant 0 : index
    %109 = vector.load %arg4[%c0_143, %c0_144] : memref<36x288xf32, #tpu.memory_space<vmem>>, vector<36x288xf32>
    %cst = arith.constant dense<0.000000e+00> : vector<4x288xf32>
    %110 = tpu.matmul %0, %109, %cst {dimension_numbers = #tpu.dot_dimension_numbers<[1], [0], [0], [1], [0, 0, 1, 1], [], []>} : vector<4x36xf32>, vector<36x288xf32>, vector<4x288xf32> -> vector<4x288xf32>
    %c0_145 = arith.constant 0 : index
    %c0_146 = arith.constant 0 : index
    %c0_147 = arith.constant 0 : index
    %111 = vector.load %arg3[%c0_145, %c0_146, %c0_147] : memref<1x4x288xf32, #tpu.memory_space<vmem>>, vector<1x4x288xf32>
    %112 = vector.shape_cast %111 : vector<1x4x288xf32> to vector<4x288xf32>
    %113 = vector.shape_cast %110 : vector<4x288xf32> to vector<1x4x288xf32>
    tpu.vector_store %arg3[%c0_145, %c0_146, %c0_147], %113 {strides = array<i32>} : memref<1x4x288xf32, #tpu.memory_space<vmem>>, vector<1x4x288xf32>,
    return
  }
  func.func @transform_0(%arg0: i32) -> (i32, i32) {
    %c0_i32 = arith.constant 0 : i32
    %c0_i32_0 = arith.constant 0 : i32
    %c0_i32_1 = arith.constant 0 : i32
    return %c0_i32, %c0_i32_0 : i32, i32
  }
  func.func @transform_1(%arg0: i32) -> (i32, i32, i32) {
    %c0_i32 = arith.constant 0 : i32
    %c0_i32_0 = arith.constant 0 : i32
    %c0_i32_1 = arith.constant 0 : i32
    return %arg0, %c0_i32, %c0_i32_0 : i32, i32, i32
  }
  func.func @transform_2(%arg0: i32) -> (i32, i32, i32) {
    %c0_i32 = arith.constant 0 : i32
    %c0_i32_0 = arith.constant 0 : i32
    %c0_i32_1 = arith.constant 0 : i32
    return %arg0, %c0_i32, %c0_i32_0 : i32, i32, i32
  }
}

</mosaic_0001>

<bundles_post_ra>
// kernel: tpu_custom_call.1
= control target key start
LH: loop header
LB: loop body
LE: loop exit
PB: predicated region body
PF: predicated region fallthrough
CT: control target
= control target key end

     0   :  { %7 = vsyncpa [#allocation4], 0  ;;  %s1440_s0 = inlined_call_operand.hbm [shape: f32[4,36], index: 0, kind: input, shape index: {}]   ;;  %s1441_s1 = inlined_call_operand.hbm [shape: f32[2,4,327], index: 1, kind: input, shape index: {}]   ;;  %s1442_s2 = inlined_call_operand.hbm [shape: f32[2,4,288], index: 2, kind: output, shape index: {}]  }
   0x1   :  { %8 = vsyncpa [#allocation7], 0 }
   0x2   :  { %10 = vsyncpa [#allocation7 + $0x1], 0 }
   0x3   :  { %11 = vsyncpa [#allocation5], 0 }
   0x4   :  { %13 = vsyncpa [#allocation5 + $0x1], 0  ;;  %s1082_s9 = smov 0   ;;  %s1084_s10 = smov 0  }
   0x5   :  { %s1086_s11 = smov 0   ;;  %s1088_s12 = smov 0  }
   0x6 LB: > { %s1103_s13 = sadd.s32 4294967295, %s1052_s12   ;;  %s798_s14 = sadd.s32 4294967294, %s1052_s12   ;;  %s1052_s12 = sphi %s1088_s12, %s1467_s12   ;;  %s1048_s11 = sphi %s1086_s11, %s1466_s11   ;;  %s1044_s10 = sphi %s1084_s10, %s1465_s10   ;;  %s1040_s9 = sphi %s1082_s9, %s1464_s9  }
   0x7   : > { %p60_p0 = scmp.ne.s32.totalorder %s1044_s10, %s1040_s9  ;;  %p1443_p1 = scmp.eq.s32.totalorder %s1103_s13, 0 }
   0x8   : > { %p90_p3 = scmp.eq.s32.totalorder %s798_s14, 1  ;;  %p799_p5 = scmp.ge.s32.totalorder %s1052_s12, 1 }
   0x9   : > { %p1112_p4 = por %p1443_p1, %p60_p0  ;;  %p97_p7 = scmp.lt.s32.totalorder %s1052_s12, 3 }
   0xa   : > { %p1117_p6 = por %p90_p3, %p60_p0  ;;  %s1054_s18 = smov [#allocation3]  }
   0xb   : > { %s1447_s15 = scalar_select %p1112_p4, 1, 0 }
   0xc   : > { %s1448_s16 = scalar_select %p1117_p6, 1, 0 }
   0xd   : > { %p1122_p8 = pnand %p799_p5, %p97_p7  ;;  %s110_s19 = sshll.u32 %s1054_s18, 4  ;;  %s111_s19 = int_to_ptr.vmem [resolvable:$true] %s110_s19 }
   0xe   : > { %s1130_s20 = sadd.s32 1, %s1052_s12   ;;  %s47_s24 = sadd.s32 1, %s1048_s11 }
   0xf   : > { %s1449_s17 = scalar_select %p1122_p8, 1, 0 }
  0x10   : > { %p871_p10 = pneg %p1122_p8  ;;  %s44_s22 = ssub.s32 %s1052_s12, %s1130_s20 }
  0x11   : > { %p1140_p12 = scmp.eq.s32.totalorder %s44_s22, 0  ;;  %p54_p13 = scmp.ne.s32.totalorder %s1048_s11, %s1044_s10 }
  0x12   : > { %p1134_p11 = pnand %p871_p10, %p1443_p1  ;;  %s941_s25 = scalar_lea.vmem %s111_s19, 64 }
  0x13   : > { %p942_p3 = scmp.ne.s32.totalorder %s111_s19, %s941_s25  ;;  %p949_p9 = scmp.lt.s32.totalorder %s111_s19, %s111_s19 }
  0x14   : > { %p932_p0 = pneg %p1134_p11  ;;  %p950_p2 = scmp.lt.s32.totalorder %s941_s25, %s941_s25 }
  0x16   : > { %p944_p5 = pnand %p942_p3, %p932_p0  ;;  %p951_p10 = por %p950_p2, %p949_p9 }
  0x18   : > { %p945_p7 = pneg %p944_p5 }
  0x1a   : > { %p952_p1 = pnand %p951_p10, %p945_p7 }
  0x1c   : > { %955 = shalt.err (!%p952_p1)
}
  0x1d   : > { %874 = dma.hbm_to_vmem [thread:$0]  (!%p1134_p11), %s1440_s0, 64, %s111_s19, [#allocation4]  }
  0x1e   : > { %s1157_s28 = scalar_select %p1140_p12, %s1048_s11, %s47_s24  }
  0x1f   : > { %p55_p1 = scmp.eq.s32.totalorder %s1052_s12, 0  ;;  %p1452_p2 = scmp.eq.s32.totalorder %s1103_s13, 1 }
  0x20   : > { %p884_p0 = scmp.lt.s32.totalorder %s1052_s12, 2  ;;  %s121_s30 = sand.u32 1, %s1048_s11  }
  0x21   : > { %p1165_p9 = por %p1452_p2, %p54_p13  ;;  %p56_p3 = por %p55_p1, %p54_p13 }
  0x22   : > { %s859_s3 = smul.u32 12, %s121_s30  ;;  %s122_s19 = scalar_lea.sflag [#allocation7], %s121_s30 }
  0x23   : > { %s1453_s29 = scalar_select %p1165_p9, 1, 0 }
  0x24   : > { %s860_s4 = smul.u32 192, %s1052_s12  ;;  %p1175_p5 = pnand %p884_p0, %p56_p3 }
  0x25   : > { %s125_s14 = scalar_lea.vmem [#allocation6], %s859_s3  ;;  %s961_s24 = scalar_lea.hbm %s1441_s1, 384 }
  0x26   : > { %s1182_s8 = scalar_lea.hbm %s1441_s1, %s860_s4  ;;  %s133_s18 = sshll.u32 %s125_s14, 4  ;;  %s134_s18 = int_to_ptr.vmem [resolvable:$true] %s133_s18 }
  0x27   : > { %s956_s21 = scalar_lea.hbm %s1182_s8, 192  ;;  %p958_p12 = pneg %p1175_p5 }
  0x28   : > { %p957_p11 = scmp.ne.s32.totalorder %s1182_s8, %s956_s21  ;;  %p962_p10 = scmp.lt.s32.totalorder %s1182_s8, %s1441_s1 }
  0x29   : > { %p963_p1 = scmp.lt.s32.totalorder %s961_s24, %s956_s21 }
  0x2a   : > { %p959_p13 = pnand %p958_p12, %p957_p11 }
  0x2b   : > { %p964_p2 = por %p963_p1, %p962_p10 }
  0x2c   : > { %p960_p7 = pneg %p959_p13 }
  0x2e   : > { %p965_p0 = pnand %p964_p2, %p960_p7 }
  0x30   : > { %968 = shalt.err (!%p965_p0)
}
  0x31   : > { %s969_s27 = scalar_lea.vmem %s134_s18, 192  ;;  %s1055_s30 = smov [#allocation6]  }
  0x32   : > { %p970_p3 = scmp.ne.s32.totalorder %s134_s18, %s969_s27  ;;  %s974_s3 = sshll.u32 %s1055_s30, 4  ;;  %s975_s3 = int_to_ptr.vmem [resolvable:$false] %s974_s3 }
  0x33   : > { %s976_s4 = scalar_lea.vmem %s975_s3, 384  ;;  %p977_p11 = scmp.lt.s32.totalorder %s134_s18, %s975_s3 }
  0x34   : > { %p972_p6 = pnand %p970_p3, %p958_p12  ;;  %p978_p13 = scmp.lt.s32.totalorder %s976_s4, %s969_s27 }
  0x36   : > { %p973_p9 = pneg %p972_p6  ;;  %p979_p4 = por %p978_p13, %p977_p11 }
  0x38   : > { %p980_p8 = pnand %p979_p4, %p973_p9 }
  0x3a   : > { %983 = shalt.err (!%p980_p8)
}
  0x3b   : > { %878 = dma.hbm_to_vmem [thread:$0]  (!%p1175_p5), %s1182_s8, 192, %s134_s18, %s122_s19  }
  0x3c   : > { %p1455_p7 = scmp.ne.s32.totalorder %s1449_s17, 0 }
  0x3d   : > { %p1456_p10 = scmp.eq.s32.totalorder (!%p1455_p7), %s1103_s13, 0 }
  0x3e   : > { %142 = sbr.rel (%p1455_p7) target bundleno = 473 (0x1d9), region = 28 }
  0x43   : > { %1027 = dma.done.wait (%p1456_p10), [#allocation4], 64   ;;  %p1457_p6 = pmov %p1456_p10 }
  0x44   : > { %s1205_s6 = sand.u32 1, %s1044_s10   ;;  %p1458_p4 = scmp.ne.s32.totalorder %s1447_s15, 0 }
  0x45   : > { %1029 = vsyncadd (%p1457_p6), [#allocation4], 4294967232  ;;  %s861_s7 = smul.u32 12, %s1205_s6  ;;  %s149_s5 = scalar_lea.sflag [#allocation7], %s1205_s6 }
  0x47   : > { %s1211_s8 = scalar_lea.vmem [#allocation6], %s861_s7 }
  0x48   : > { %1031 = dma.done.wait (%p1458_p4), %s149_s5, 192  }
  0x49   : > { %1033 = vsyncadd (%p1458_p4), %s149_s5, 4294967104  ;;  %v830_v0 = vld [vmem:[%s1211_s8 + $0x3] ss:$4 sm:$0x7]  ;;  %s1056_s17 = smov 91   ;;  %s1057_s14 = smov 108   ;;  %v175_v8 = vlaneseq }
  0x4a   : > { %v828_v1 = vld [vmem:[%s1211_s8 + $0x3] ss:$4 sm:$0x7]  ;;  %506 = vrot.lane.b32.xlu1 %v830_v0, %s1056_s17  ;;  %s1058_s15 = smov 90   ;;  %s1059_s18 = smov 92   ;;  %v1063_v15 = vmov 0.0  }
  0x4b   : > { %486 = vrot.lane.b32.xlu0 %v828_v1, %s1057_s14  ;;  %v831_v2 = vld [vmem:[%s1211_s8 + $0x3] ss:$4 sm:$0x7]  ;;  %v821_v4 = vld [vmem:[%s1211_s8 + $0x2] ss:$4 sm:$0x7]  ;;  %846 = vmatprep.subr.mxu1 %v1063_v15 }
  0x4c   : > { %v829_v3 = vld [vmem:[%s1211_s8 + $0x3] ss:$4 sm:$0x7]  ;;  %v820_v5 = vld [vmem:[%s1211_s8 + $0x2] ss:$4 sm:$0x7]  ;;  %617 = vmatprep.mubr.f32.mxu0 %v1063_v15 }
  0x4d   : > { %v824_v6 = vld [vmem:[%s1211_s8 + $0x3] ss:$4 sm:$0x7]  ;;  %v822_v7 = vld [vmem:[%s1211_s8 + $0x2] ss:$4 sm:$0x7] }
  0x4e   : > { %516 = vrot.lane.b32.xlu1 %v831_v2, %s1058_s15  ;;  %s1060_s19 = smov 127   ;;  %v826_v9 = vld [vmem:[%s1211_s8 + $0x3] ss:$4 sm:$0x7]  ;;  %s1061_s21 = smov 110   ;;  %vm1237_vm0 = vcmp.lt.s32.totalorder %v175_v8, 288 }
  0x4f   : > { %496 = vrot.lane.b32.xlu0 %v829_v3, %s1059_s18  ;;  %v825_v10 = vld [vmem:[%s1211_s8 + $0x3] ss:$4 sm:$0x7]  ;;  %s1062_s22 = smov 126   ;;  %s1064_s23 = smov 109   ;;  %vm1065_vm1 = vmmov 0  }
  0x50   : > { %v823_v12 = vld [vmem:[%s1211_s8 + $0x3] ss:$4 sm:$0x7]  ;;  %v812_v14 = vld [vmem:[%s1211_s8 + $0x1] ss:$4 sm:$0x7]  ;;  %856 = vmatprep.mubr.msk.f32.mxu1 %vm1065_vm1, %v1063_v15 }
  0x51   : > { %v827_v13 = vld [vmem:[%s1211_s8 + $0x3] ss:$4 sm:$0x7]  ;;  %442 = vst.msk [vmem:[#allocation2 + $0x4b] ss:$8 sm:$0x7] %vm1237_vm0, %v823_v12 }
  0x52   : > { %421 = vrot.lane.b32.xlu1 %v821_v4, %s1056_s17  ;;  %v813_v16 = vld [vmem:[%s1211_s8 + $0x1] ss:$4 sm:$0x7]  ;;  %v815_v17 = vld [vmem:[%s1211_s8 + $0x2] ss:$4 sm:$0x7] }
  0x53   : > { %411 = vrot.lane.b32.xlu0 %v820_v5, %s1059_s18  ;;  %v814_v18 = vld [vmem:[%s1211_s8 + $0x2] ss:$4 sm:$0x7]  ;;  %v806_v23 = vld [vmem:[%s1211_s8 + $0x1] ss:$4 sm:$0x7] }
  0x54   : > { %357 = vst.msk [vmem:[#allocation2 + $0x32] ss:$8 sm:$0x7] %vm1237_vm0, %v814_v18  ;;  %v816_v19 = vld [vmem:[%s1211_s8 + $0x2] ss:$4 sm:$0x7] }
  0x55   : > { %v817_v20 = vld [vmem:[%s1211_s8 + $0x2] ss:$4 sm:$0x7]  ;;  %v258_v24 = vld [vmem:[%s1211_s8] ss:$4 sm:$0x7] }
  0x56   : > { %446 = vrot.lane.b32.xlu1 %v824_v6, %s1060_s19  ;;  %v818_v21 = vld [vmem:[%s1211_s8 + $0x2] ss:$4 sm:$0x7]  ;;  %v808_v25 = vld [vmem:[%s1211_s8 + $0x1] ss:$4 sm:$0x7] }
  0x57   : > { %431 = vrot.lane.b32.xlu0 %v822_v7, %s1058_s15  ;;  %v819_v22 = vld [vmem:[%s1211_s8 + $0x2] ss:$4 sm:$0x7]  ;;  %v807_v26 = vld [vmem:[%s1211_s8 + $0x1] ss:$4 sm:$0x7] }
  0x58   : > { %v805_v27 = vld [vmem:[%s1211_s8 + $0x1] ss:$4 sm:$0x7]  ;;  %v181_v31 = vld [vmem:[%s1211_s8] ss:$4 sm:$0x7] }
  0x59   : > { %272 = vst.msk [vmem:[#allocation2 + $0x19] ss:$8 sm:$0x7] %vm1237_vm0, %v805_v27  ;;  %v810_v28 = vld [vmem:[%s1211_s8 + $0x1] ss:$4 sm:$0x7] }
  0x5a   : > { %466 = vrot.lane.b32.xlu1 %v826_v9, %s1061_s21  ;;  %v809_v29 = vld [vmem:[%s1211_s8 + $0x1] ss:$4 sm:$0x7]  ;;  %v192_v32 = vld [vmem:[%s1211_s8] ss:$4 sm:$0x7] }
  0x5b   : > { %456 = vrot.lane.b32.xlu0 %v825_v10, %s1062_s22  ;;  %v811_v30 = vld [vmem:[%s1211_s8 + $0x1] ss:$4 sm:$0x7]  ;;  %v203_v33 = vld [vmem:[%s1211_s8] ss:$4 sm:$0x7] }
  0x5c   : > { %v174_v34 = vld [vmem:[%s1211_s8] ss:$4 sm:$0x7]  ;;  %vm252_vm2 = vcmask 744448   ;;  %vm230_vm3 = vcmask 883712   ;;  %vm263_vm4 = vcmask 736256  }
  0x5d   : > { %179 = vst.msk [vmem:[#allocation2] ss:$8 sm:$0x7] %vm1237_vm0, %v174_v34  ;;  %v214_v35 = vld [vmem:[%s1211_s8] ss:$4 sm:$0x7] }
  0x5e   : > { %336 = vrot.lane.b32.xlu1 %v812_v14, %s1056_s17  ;;  %v225_v36 = vld [vmem:[%s1211_s8] ss:$4 sm:$0x7]  ;;  %vm241_vm5 = vcmask 752640   ;;  %vm186_vm6 = vcmask 1039360   ;;  %vm543_vm7 = vcmask 1043456  }
  0x5f   : > { %476 = vrot.lane.b32.xlu0 %v827_v13, %s1064_s23  ;;  %v236_v37 = vld [vmem:[%s1211_s8] ss:$4 sm:$0x7]  ;;  %vm208_vm8 = vcmask 900096   ;;  %vm197_vm9 = vcmask 1031168   ;;  %vm219_vm10 = vcmask 891904  }
  0x60   : > { %v247_v38 = vld [vmem:[%s1211_s8] ss:$4 sm:$0x7]  ;;  %vm539_vm11 = vcmask 293888   ;;  %vm699_vm12 = vcmask 257024   ;;  %s862_s24 = smul.u32 192, %s1103_s13 }
  0x61   : > { %s172_s25 = scalar_lea.vmem [#allocation8], %s861_s7  ;;  %s702_s4 = scalar_lea.sflag [#allocation5], %s1205_s6 }
  0x62   : > { %361 = vrot.lane.b32.xlu1 %v815_v17, %s1060_s19  ;;  %s716_s26 = sshll.u32 %s172_s25, 4  ;;  %s714_s3 = scalar_lea.hbm %s1442_s2, %s862_s24  ;;  %s717_s26 = int_to_ptr.vmem [resolvable:$true] %s716_s26 }
  0x63   : > { %346 = vrot.lane.b32.xlu0 %v813_v16, %s1058_s15  ;;  %s984_s5 = scalar_lea.vmem %s717_s26, 192  ;;  %p1461_p9 = scmp.ne.s32.totalorder %s1453_s29, 0 }
  0x64   : > { %p985_p8 = scmp.ne.s32.totalorder %s717_s26, %s984_s5  ;;  %s1066_s13 = smov [#allocation8]  }
  0x65   : > { %s988_s8 = sshll.u32 %s1066_s13, 4  ;;  %s989_s8 = int_to_ptr.vmem [resolvable:$false] %s988_s8 }
  0x66   : > { %381 = vrot.lane.b32.xlu1 %v817_v20, %s1061_s21  ;;  %p986_p5 = pnand %p985_p8, %p1461_p9  ;;  %s990_s7 = scalar_lea.vmem %s989_s8, 384 }
  0x67   : > { %371 = vrot.lane.b32.xlu0 %v816_v19, %s1062_s22  ;;  %p991_p1 = scmp.lt.s32.totalorder %s717_s26, %s989_s8  ;;  %p992_p2 = scmp.lt.s32.totalorder %s990_s7, %s984_s5 }
  0x68   : > { %p987_p12 = pneg %p986_p5 }
  0x69   : > { %p993_p0 = por %p992_p2, %p991_p1 }
  0x6a   : > { %401 = vrot.lane.b32.xlu1 %v819_v22, %s1057_s14 }
  0x6b   : > { %391 = vrot.lane.b32.xlu0 %v818_v21, %s1064_s23  ;;  %p994_p3 = pnand %p993_p0, %p987_p12 }
  0x6e   : > { %276 = vrot.lane.b32.xlu1 %v806_v23, %s1060_s19 }
  0x6f   : > { %260 = vrot.lane.b32.xlu0 %v258_v24, %s1058_s15 }
  0x72   : > { %296 = vrot.lane.b32.xlu1 %v808_v25, %s1061_s21 }
  0x73   : > { %286 = vrot.lane.b32.xlu0 %v807_v26, %s1062_s22 }
  0x76   : > { %316 = vrot.lane.b32.xlu1 %v810_v28, %s1057_s14 }
  0x77   : > { %306 = vrot.lane.b32.xlu0 %v809_v29, %s1064_s23 }
  0x7a   : > { %183 = vrot.lane.b32.xlu1 %v181_v31, %s1060_s19 }
  0x7b   : > { %326 = vrot.lane.b32.xlu0 %v811_v30, %s1059_s18 }
  0x7e   : > { %205 = vrot.lane.b32.xlu1 %v203_v33, %s1061_s21 }
  0x7f   : > { %194 = vrot.lane.b32.xlu0 %v192_v32, %s1062_s22 }
  0x82   : > { %227 = vrot.lane.b32.xlu1 %v225_v36, %s1057_s14 }
  0x83   : > { %216 = vrot.lane.b32.xlu0 %v214_v35, %s1064_s23 }
  0x86   : > { %249 = vrot.lane.b32.xlu1 %v247_v38, %s1056_s17 }
  0x87   : > { %238 = vrot.lane.b32.xlu0 %v236_v37, %s1059_s18 }
  0xbc   : > { %v507_v39 = vpop.permute.xlu1 %506 }
  0xbd   : > { %v487_v40 = vpop.permute.xlu0 %486  ;;  %v508_v41 = vrot.slane %v507_v39, 1 }
  0xbe   : > { %v488_v42 = vrot.slane %v487_v40, 1 }
  0xbf   : > { %v509_v43 = vsel %vm252_vm2, %v507_v39, %v508_v41 }
  0xc0   : > { %v489_v44 = vsel %vm230_vm3, %v487_v40, %v488_v42  ;;  %512 = vst.msk [vmem:[#allocation2 + $0x62] ss:$8 sm:$0x7] %vm1237_vm0, %v509_v43  ;;  %v517_v45 = vpop.permute.xlu1 %516 }
  0xc1   : > { %492 = vst.msk [vmem:[#allocation2 + $0x60] ss:$8 sm:$0x7] %vm1237_vm0, %v489_v44  ;;  %v497_v46 = vpop.permute.xlu0 %496  ;;  %v518_v47 = vrot.slane %v517_v45, 1 }
  0xc2   : > { %v498_v48 = vrot.slane %v497_v46, 1 }
  0xc3   : > { %v519_v49 = vsel %vm263_vm4, %v517_v45, %v518_v47 }
  0xc4   : > { %v499_v50 = vsel %vm241_vm5, %v497_v46, %v498_v48  ;;  %522 = vst.msk [vmem:[#allocation2 + $0x63] ss:$8 sm:$0x7] %vm1237_vm0, %v519_v49  ;;  %v422_v51 = vpop.permute.xlu1 %421 }
  0xc5   : > { %502 = vst.msk [vmem:[#allocation2 + $0x61] ss:$8 sm:$0x7] %vm1237_vm0, %v499_v50  ;;  %v412_v52 = vpop.permute.xlu0 %411  ;;  %v423_v53 = vrot.slane %v422_v51, 1 }
  0xc6   : > { %v413_v54 = vrot.slane %v412_v52, 1 }
  0xc7   : > { %v424_v55 = vsel %vm252_vm2, %v422_v51, %v423_v53 }
  0xc8   : > { %v414_v56 = vsel %vm241_vm5, %v412_v52, %v413_v54  ;;  %427 = vst.msk [vmem:[#allocation2 + $0x49] ss:$8 sm:$0x7] %vm1237_vm0, %v424_v55  ;;  %v447_v57 = vpop.permute.xlu1 %446 }
  0xc9   : > { %417 = vst.msk [vmem:[#allocation2 + $0x48] ss:$8 sm:$0x7] %vm1237_vm0, %v414_v56  ;;  %v432_v58 = vpop.permute.xlu0 %431  ;;  %v448_v59 = vrot.slane %v447_v57, 1 }
  0xca   : > { %v433_v60 = vrot.slane %v432_v58, 1 }
  0xcb   : > { %v449_v61 = vsel %vm186_vm6, %v447_v57, %v448_v59 }
  0xcc   : > { %v434_v62 = vsel %vm263_vm4, %v432_v58, %v433_v60  ;;  %v537_v63 = vld [vmem:[#allocation2 + $0x68] sm:$0xf]  ;;  %v538_v0 = vld [vmem:[#allocation2 + $0x70] sm:$0xf]  ;;  %v536_v1 = vld [vmem:[#allocation2 + $0x60] sm:$0xf]  ;;  %v467_v2 = vpop.permute.xlu1 %466 }
  0xcd   : > { %452 = vst.msk [vmem:[#allocation2 + $0x4c] ss:$8 sm:$0x7] %vm1237_vm0, %v449_v61  ;;  %437 = vst.msk [vmem:[#allocation2 + $0x4a] ss:$8 sm:$0x7] %vm1237_vm0, %v434_v62  ;;  %832 = vmatprep.subr.msk.mxu0 %vm543_vm7, %v537_v63  ;;  %847 = vmatpush3.msk.msra.mxu1 %vm543_vm7, %v538_v0  ;;  %v457_v3 = vpop.permute.xlu0 %456 }
  0xce   : > { %v468_v4 = vrot.slane %v467_v2, 1  ;;  %v458_v5 = vrot.slane %v457_v3, 1  ;;  %833 = vmatpush1.msk.msra.mxu0 %vm543_vm7, %v536_v1  ;;  %848 = vmatprep.subr.mxu1 %v1063_v15 }
  0xd0   : > { %v469_v6 = vsel %vm208_vm8, %v467_v2, %v468_v4  ;;  %v459_v7 = vsel %vm197_vm9, %v457_v3, %v458_v5  ;;  %v337_v9 = vpop.permute.xlu1 %336 }
  0xd1   : > { %472 = vst.msk [vmem:[#allocation2 + $0x4e] ss:$8 sm:$0x7] %vm1237_vm0, %v469_v6  ;;  %462 = vst.msk [vmem:[#allocation2 + $0x4d] ss:$8 sm:$0x7] %vm1237_vm0, %v459_v7  ;;  %v477_v8 = vpop.permute.xlu0 %476 }
  0xd2   : > { %v478_v10 = vrot.slane %v477_v8, 1  ;;  %v338_v12 = vrot.slane %v337_v9, 1 }
  0xd4   : > { %v479_v13 = vsel %vm219_vm10, %v477_v8, %v478_v10  ;;  %v339_v14 = vsel %vm252_vm2, %v337_v9, %v338_v12  ;;  %v362_v17 = vpop.permute.xlu1 %361 }
  0xd5   : > { %482 = vst.msk [vmem:[#allocation2 + $0x4f] ss:$8 sm:$0x7] %vm1237_vm0, %v479_v13  ;;  %342 = vst.msk [vmem:[#allocation2 + $0x30] ss:$8 sm:$0x7] %vm1237_vm0, %v339_v14  ;;  %v347_v16 = vpop.permute.xlu0 %346 }
  0xd6   : > { %v348_v18 = vrot.slane %v347_v16, 1  ;;  %v363_v19 = vrot.slane %v362_v17, 1 }
  0xd8   : > { %v349_v20 = vsel %vm263_vm4, %v347_v16, %v348_v18  ;;  %v364_v21 = vsel %vm186_vm6, %v362_v17, %v363_v19  ;;  %v382_v23 = vpop.permute.xlu1 %381 }
  0xd9   : > { %352 = vst.msk [vmem:[#allocation2 + $0x31] ss:$8 sm:$0x7] %vm1237_vm0, %v349_v20  ;;  %367 = vst.msk [vmem:[#allocation2 + $0x33] ss:$8 sm:$0x7] %vm1237_vm0, %v364_v21  ;;  %v372_v22 = vpop.permute.xlu0 %371 }
  0xda   : > { %v373_v24 = vrot.slane %v372_v22, 1  ;;  %v383_v25 = vrot.slane %v382_v23, 1 }
  0xdc   : > { %v374_v26 = vsel %vm197_vm9, %v372_v22, %v373_v24  ;;  %v384_v27 = vsel %vm208_vm8, %v382_v23, %v383_v25  ;;  %v534_v28 = vld [vmem:[#allocation2 + $0x50] sm:$0xff]  ;;  %v535_v29 = vld [vmem:[#allocation2 + $0x58] sm:$0xff]  ;;  %v533_v30 = vld [vmem:[#allocation2 + $0x48] sm:$0xff]  ;;  %v402_v32 = vpop.permute.xlu1 %401 }
  0xdd   : > { %377 = vst.msk [vmem:[#allocation2 + $0x34] ss:$8 sm:$0x7] %vm1237_vm0, %v374_v26  ;;  %387 = vst.msk [vmem:[#allocation2 + $0x35] ss:$8 sm:$0x7] %vm1237_vm0, %v384_v27  ;;  %577 = vmatprep.subr.mxu0 %v534_v28  ;;  %849 = vmatpush3.msra.mxu1 %v535_v29  ;;  %v392_v31 = vpop.permute.xlu0 %391 }
  0xde   : > { %v393_v33 = vrot.slane %v392_v31, 1  ;;  %v403_v34 = vrot.slane %v402_v32, 1  ;;  %578 = vmatpush1.msra.mxu0 %v533_v30  ;;  %850 = vmatprep.subr.mxu1 %v1063_v15  ;;  %v173_v23 = vld [vmem:[#allocation3] sm:$0xf] }
  0xe0   : > { %v394_v35 = vsel %vm219_vm10, %v392_v31, %v393_v33  ;;  %v404_v36 = vsel %vm230_vm3, %v402_v32, %v403_v34  ;;  %v277_v37 = vpop.permute.xlu1 %276 }
  0xe1   : > { %397 = vst.msk [vmem:[#allocation2 + $0x36] ss:$8 sm:$0x7] %vm1237_vm0, %v394_v35  ;;  %407 = vst.msk [vmem:[#allocation2 + $0x37] ss:$8 sm:$0x7] %vm1237_vm0, %v404_v36  ;;  %v261_v38 = vpop.permute.xlu0 %260 }
  0xe2   : > { %v278_v39 = vrot.slane %v277_v37, 1  ;;  %v262_v40 = vrot.slane %v261_v38, 1 }
  0xe4   : > { %v279_v41 = vsel %vm186_vm6, %v277_v37, %v278_v39  ;;  %v264_v42 = vsel %vm263_vm4, %v261_v38, %v262_v40  ;;  %v297_v43 = vpop.permute.xlu1 %296 }
  0xe5   : > { %282 = vst.msk [vmem:[#allocation2 + $0x1a] ss:$8 sm:$0x7] %vm1237_vm0, %v279_v41  ;;  %267 = vst.msk [vmem:[#allocation2 + $0x18] ss:$8 sm:$0x7] %vm1237_vm0, %v264_v42  ;;  %v287_v44 = vpop.permute.xlu0 %286 }
  0xe6   : > { %v298_v45 = vrot.slane %v297_v43, 1  ;;  %v288_v46 = vrot.slane %v287_v44, 1 }
  0xe8   : > { %v299_v47 = vsel %vm208_vm8, %v297_v43, %v298_v45  ;;  %v289_v48 = vsel %vm197_vm9, %v287_v44, %v288_v46  ;;  %v531_v49 = vld [vmem:[#allocation2 + $0x38] sm:$0xff]  ;;  %v532_v50 = vld [vmem:[#allocation2 + $0x40] sm:$0xff]  ;;  %v530_v51 = vld [vmem:[#allocation2 + $0x30] sm:$0xff]  ;;  %v317_v52 = vpop.permute.xlu1 %316 }
  0xe9   : > { %302 = vst.msk [vmem:[#allocation2 + $0x1c] ss:$8 sm:$0x7] %vm1237_vm0, %v299_v47  ;;  %292 = vst.msk [vmem:[#allocation2 + $0x1b] ss:$8 sm:$0x7] %vm1237_vm0, %v289_v48  ;;  %579 = vmatprep.subr.mxu0 %v531_v49  ;;  %851 = vmatpush3.msra.mxu1 %v532_v50  ;;  %v307_v53 = vpop.permute.xlu0 %306 }
  0xea   : > { %v318_v54 = vrot.slane %v317_v52, 1  ;;  %v308_v55 = vrot.slane %v307_v53, 1  ;;  %580 = vmatpush1.msra.mxu0 %v530_v51  ;;  %852 = vmatprep.subr.mxu1 %v1063_v15 }
  0xec   : > { %v319_v56 = vsel %vm230_vm3, %v317_v52, %v318_v54  ;;  %v309_v57 = vsel %vm219_vm10, %v307_v53, %v308_v55  ;;  %v184_v59 = vpop.permute.xlu1 %183 }
  0xed   : > { %322 = vst.msk [vmem:[#allocation2 + $0x1e] ss:$8 sm:$0x7] %vm1237_vm0, %v319_v56  ;;  %312 = vst.msk [vmem:[#allocation2 + $0x1d] ss:$8 sm:$0x7] %vm1237_vm0, %v309_v57  ;;  %v327_v58 = vpop.permute.xlu0 %326 }
  0xee   : > { %v328_v60 = vrot.slane %v327_v58, 1  ;;  %v185_v61 = vrot.slane %v184_v59, 1 }
  0xf0   : > { %v329_v62 = vsel %vm241_vm5, %v327_v58, %v328_v60  ;;  %v187_v63 = vsel %vm186_vm6, %v184_v59, %v185_v61  ;;  %v206_v1 = vpop.permute.xlu1 %205 }
  0xf1   : > { %332 = vst.msk [vmem:[#allocation2 + $0x1f] ss:$8 sm:$0x7] %vm1237_vm0, %v329_v62  ;;  %190 = vst.msk [vmem:[#allocation2 + $0x1] ss:$8 sm:$0x7] %vm1237_vm0, %v187_v63  ;;  %v195_v0 = vpop.permute.xlu0 %194 }
  0xf2   : > { %v196_v2 = vrot.slane %v195_v0, 1  ;;  %v207_v3 = vrot.slane %v206_v1, 1 }
  0xf4   : > { %v198_v4 = vsel %vm197_vm9, %v195_v0, %v196_v2  ;;  %v209_v5 = vsel %vm208_vm8, %v206_v1, %v207_v3  ;;  %v228_v7 = vpop.permute.xlu1 %227 }
  0xf5   : > { %201 = vst.msk [vmem:[#allocation2 + $0x2] ss:$8 sm:$0x7] %vm1237_vm0, %v198_v4  ;;  %212 = vst.msk [vmem:[#allocation2 + $0x3] ss:$8 sm:$0x7] %vm1237_vm0, %v209_v5  ;;  %v217_v6 = vpop.permute.xlu0 %216 }
  0xf6   : > { %v218_v8 = vrot.slane %v217_v6, 1  ;;  %v229_v9 = vrot.slane %v228_v7, 1 }
  0xf8   : > { %v220_v10 = vsel %vm219_vm10, %v217_v6, %v218_v8  ;;  %v231_v12 = vsel %vm230_vm3, %v228_v7, %v229_v9  ;;  %v528_v13 = vld [vmem:[#allocation2 + $0x20] sm:$0xff]  ;;  %v529_v14 = vld [vmem:[#allocation2 + $0x28] sm:$0xff]  ;;  %v527_v16 = vld [vmem:[#allocation2 + $0x18] sm:$0xff]  ;;  %v250_v18 = vpop.permute.xlu1 %249 }
  0xf9   : > { %223 = vst.msk [vmem:[#allocation2 + $0x4] ss:$8 sm:$0x7] %vm1237_vm0, %v220_v10  ;;  %234 = vst.msk [vmem:[#allocation2 + $0x5] ss:$8 sm:$0x7] %vm1237_vm0, %v231_v12  ;;  %581 = vmatprep.subr.mxu0 %v528_v13  ;;  %853 = vmatpush3.msra.mxu1 %v529_v14  ;;  %v239_v17 = vpop.permute.xlu0 %238 }
  0xfa   : > { %v240_v19 = vrot.slane %v239_v17, 1  ;;  %v251_v20 = vrot.slane %v250_v18, 1  ;;  %582 = vmatpush1.msra.mxu0 %v527_v16  ;;  %854 = vmatprep.subr.mxu1 %v1063_v15 }
  0xfc   : > { %v242_v21 = vsel %vm241_vm5, %v239_v17, %v240_v19  ;;  %v253_v22 = vsel %vm252_vm2, %v250_v18, %v251_v20 }
  0xfd   : > { %245 = vst.msk [vmem:[#allocation2 + $0x6] ss:$8 sm:$0x7] %vm1237_vm0, %v242_v21  ;;  %256 = vst.msk [vmem:[#allocation2 + $0x7] ss:$8 sm:$0x7] %vm1237_vm0, %v253_v22 }
 0x104   : > { %v525_v24 = vld [vmem:[#allocation2 + $0x8] sm:$0xff]  ;;  %v526_v25 = vld [vmem:[#allocation2 + $0x10] sm:$0xff]  ;;  %v524_v26 = vld [vmem:[#allocation2] sm:$0xff] }
 0x105   : > { %583 = vmatprep.subr.mxu0 %v525_v24  ;;  %855 = vmatpush3.msra.mxu1 %v526_v25 }
 0x106   : > { %584 = vmatpush1.msra.mxu0 %v524_v26  ;;  %857 = vmatmul.mubr.msk.f32.vlgmr.msra.gmra.mxu1 %vm539_vm11, %v173_v23 }
 0x107   : > { %834 = vmatmul.mubr.msk.f32.vlgmr.msra.gmra.mxu0 %vm539_vm11, %v173_v23 }
 0x1c6   : > { %v690_v15 = vpop.f32.mrf.mxu1 }
 0x1c7   : > { %v619_v27 = vpop.f32.mrf.mxu0  ;;  %700 = vst.msk [vmem:[%s172_s25 + $0x8] sm:$0xf] %vm699_vm12, %v690_v15 }
 0x1c8   : > { %v858_v11 = vpop.f32.mrf.mxu1 }
 0x1c9   : > { %v621_v28 = vpop.f32.mrf.mxu0 }
 0x1ca   : > { %v696_v29 = vcombine.low %v619_v27, %v621_v28 }
 0x1cc   : > { %698 = vst [vmem:[%s172_s25] sm:$0xff] %v696_v29 }
 0x1cd   : > { %997 = shalt.err (!%p994_p3)
}
 0x1ce   : > { %s998_s17 = scalar_lea.hbm %s714_s3, 192  ;;  %s1002_s15 = scalar_lea.hbm %s1442_s2, 384 }
 0x1cf   : > { %p999_p11 = scmp.ne.s32.totalorder %s714_s3, %s998_s17  ;;  %p1003_p10 = scmp.lt.s32.totalorder %s714_s3, %s1442_s2 }
 0x1d0   : > { %p1004_p6 = scmp.lt.s32.totalorder %s1002_s15, %s998_s17 }
 0x1d1   : > { %p1000_p13 = pnand %p999_p11, %p1461_p9 }
 0x1d2   : > { %p1005_p4 = por %p1004_p6, %p1003_p10 }
 0x1d3   : > { %p1001_p7 = pneg %p1000_p13 }
 0x1d5   : > { %p1006_p8 = pnand %p1005_p4, %p1001_p7 }
 0x1d7   : > { %1009 = shalt.err (!%p1006_p8)
}
 0x1d8   : > { %869 = dma.vmem_to_hbm [thread:$0]  (%p1461_p9), %s717_s26, 192, %s714_s3, %s702_s4  }
 0x1d9 PF: > { %s728_s21 = sand.u32 1, %s1040_s9   ;;  %p1462_p5 = scmp.ne.s32.totalorder %s1448_s16, 0 }
 0x1da   : > { %p1463_p12 = scmp.ge.s32.totalorder %s1052_s12, 2  ;;  %s729_s22 = scalar_lea.sflag [#allocation5], %s728_s21 }
 0x1dc   : > { %p880_p1 = pnand %p1463_p12, %p1462_p5 }
 0x1de   : > { %p881_p2 = pneg %p880_p1 }
 0x1e0   : > { %1035 = dma.done.wait (%p881_p2), %s729_s22, 192  }
 0x1e1   : > { %1037 = vsyncadd (%p881_p2), %s729_s22, 4294967104  ;;  %p16_p0 = scmp.ge.s32.totalorder %s1130_s20, 4   ;;  %s1464_s9 = smov %s1044_s10 }
 0x1e2   : > { %s1465_s10 = smov %s1048_s11  ;;  %s1466_s11 = smov %s1157_s28 }
 0x1e3   : > { %s1467_s12 = smov %s1130_s20  ;;  %18 = sbr.rel (!%p16_p0) target bundleno = 6 (0x6), region = 116 }
 0x1e8   :  { %734 = vsyncpa [#allocation4], 1 }
 0x1e9   :  { %736 = vsyncpa [#allocation4 + $0x1], 1 }
 0x1ea   :  { %737 = vsyncpa [#allocation7], 1 }
 0x1eb   :  { %739 = vsyncpa [#allocation7 + $0x1], 1 }
 0x1ec   :  { %740 = vsyncpa [#allocation5], 1 }
 0x1ed   :  { %742 = vsyncpa [#allocation5 + $0x1], 1 }

</bundles_post_ra>
